<compile_context>
chip_gen: v5e
topology: v5e:2x2
jax: 0.10.0
libtpu: 0.0.40
codegen_flags: <defaults>
</compile_context>

<pallas_src>
import math
from functools import partial

import numpy as np
import jax
import jax.numpy as jnp
from jax.experimental import pallas as pl
from jax.experimental.pallas import tpu as pltpu

EPS = 1e-5
BN_SCALE = 1.0 / math.sqrt(1.0 + EPS)                 # eval-mode BN with fresh stats
BRANCH_K = {0: 1, 1: 3, 2: 5, 3: 7, 4: 9, 5: 3}       # tap width per branch id
CONFG = {0: {"normal": [0, 1, 2, 3], "reduce": [1, 5]},
         1: {"normal": [0, 1, 2, 4], "reduce": [1, 5]},
         2: {"normal": [0, 1, 3, 4], "reduce": [1, 5]},
         3: {"normal": [0, 2, 3, 4], "reduce": [1, 5]}}
LANES = 128

_CPARAMS = pltpu.CompilerParams(dimension_semantics=("arbitrary",))


# --------------------------------------------------------------------------- kernels
def _stem_kernel(x_ref, s_ref, w_ref, o_ref, *, k_taps):
    """Conv1d(1, C, k=5, pad=2) + folded BN + ReLU.

    x_ref: (M, 1) row-flattened (N*L) signal; s_ref: (K, M, M) shift/pad selection
    matrices; w_ref: (K, C) conv taps (BN folded); o_ref: (M, C).
    """
    m = x_ref.shape[0]
    c = w_ref.shape[1]
    xb = jnp.broadcast_to(x_ref[...], (m, c))          # single input channel -> lanes
    acc = jnp.dot(s_ref[0], xb, preferred_element_type=jnp.float32) * w_ref[0:1, :]
    for d in range(1, k_taps):
        acc = acc + (jnp.dot(s_ref[d], xb, preferred_element_type=jnp.float32)
                     * w_ref[d:d + 1, :])
    o_ref[...] = jnp.maximum(acc, 0.0)


def _cell_kernel(x_ref, s_ref, wpw_ref, wdw_ref, wn_ref, o_ref, *, k_taps):
    """Fused inception cell (normal or reduce), fully VMEM-resident:

      y = relu(x @ Wpw)                   all branch 1x1 convs (+BN) as one matmul
      z = relu(sum_d (S_d @ y) * Wdw[d])  all branch depthwise / avg-pool / identity
                                          taps (+BN); padding & stride live in S_d
      o = relu(z @ Wn)                    cell-output 1x1 conv (+BN)

    (ReLU on the identity / avg-pool channels is a no-op since y >= 0.)
    """
    y = jnp.maximum(
        jnp.dot(x_ref[...], wpw_ref[...], preferred_element_type=jnp.float32), 0.0)
    z = jnp.dot(s_ref[0], y, preferred_element_type=jnp.float32) * wdw_ref[0:1, :]
    for d in range(1, k_taps):
        z = z + (jnp.dot(s_ref[d], y, preferred_element_type=jnp.float32)
                 * wdw_ref[d:d + 1, :])
    z = jnp.maximum(z, 0.0)
    o_ref[...] = jnp.maximum(
        jnp.dot(z, wn_ref[...], preferred_element_type=jnp.float32), 0.0)


def _head_kernel(x_ref, g_ref, wfc_ref, b_ref, logit_ref, feat_ref):
    """Global average pool (averaging matrix) + Linear into a 128-lane padded slab."""
    feats = jnp.dot(g_ref[...], x_ref[...], preferred_element_type=jnp.float32)
    feat_ref[...] = feats
    logit_ref[...] = (
        jnp.dot(feats, wfc_ref[...], preferred_element_type=jnp.float32) + b_ref[...])


# --------------------------------------------------------------------------- wrappers
def _full_spec(shape):
    shape = tuple(int(d) for d in shape)
    return pl.BlockSpec(shape, lambda i: (0,) * len(shape))


def stem_call(x2, s, w):
    k, m, _ = s.shape
    c = w.shape[1]
    return pl.pallas_call(
        partial(_stem_kernel, k_taps=int(k)),
        grid=(1,),
        in_specs=[_full_spec(x2.shape), _full_spec(s.shape), _full_spec(w.shape)],
        out_specs=_full_spec((m, c)),
        out_shape=jax.ShapeDtypeStruct((int(m), int(c)), jnp.float32),
        compiler_params=_CPARAMS,
    )(x2, s, w)


def cell_call(x2, s, wpw, wdw, wn):
    k, m_out, _ = s.shape
    c_out = wn.shape[1]
    return pl.pallas_call(
        partial(_cell_kernel, k_taps=int(k)),
        grid=(1,),
        in_specs=[_full_spec(x2.shape), _full_spec(s.shape), _full_spec(wpw.shape),
                  _full_spec(wdw.shape), _full_spec(wn.shape)],
        out_specs=_full_spec((m_out, c_out)),
        out_shape=jax.ShapeDtypeStruct((int(m_out), int(c_out)), jnp.float32),
        compiler_params=_CPARAMS,
    )(x2, s, wpw, wdw, wn)


def head_call(x2, g, wfc, b):
    n = g.shape[0]
    c = x2.shape[1]
    pc = wfc.shape[1]
    return pl.pallas_call(
        _head_kernel,
        grid=(1,),
        in_specs=[_full_spec(x2.shape), _full_spec(g.shape), _full_spec(wfc.shape),
                  _full_spec(b.shape)],
        out_specs=(_full_spec((n, pc)), _full_spec((n, c))),
        out_shape=(jax.ShapeDtypeStruct((int(n), int(pc)), jnp.float32),
                   jax.ShapeDtypeStruct((int(n), int(c)), jnp.float32)),
        compiler_params=_CPARAMS,
    )(x2, g, wfc, b)


# ------------------------------------------------------------------- static plan (consts)
def make_shift_matrices(n, l_in, k, pad, stride):
    """S[d]: (N*Lout, N*Lin) row-selection matrix for the d-th conv tap; encodes zero
    padding, stride and batch boundaries (block-diagonal) so the kernel never pads."""
    l_out = (l_in + 2 * pad - k) // stride + 1
    s = np.zeros((k, n * l_out, n * l_in), np.float32)
    for d in range(k):
        for b in range(n):
            for lo in range(l_out):
                li = lo * stride + d - pad
                if 0 <= li < l_in:
                    s[d, b * l_out + lo, b * l_in + li] = 1.0
    return jnp.asarray(s), l_out


def make_gap_matrix(n, l):
    g = np.zeros((n, n * l), np.float32)
    for b in range(n):
        g[b, b * l:(b + 1) * l] = 1.0 / l
    return jnp.asarray(g)


# ------------------------------------------------------------------- parameter init
class KeyGen:
    def __init__(self, seed):
        self.key = jax.random.PRNGKey(seed)

    def __call__(self):
        self.key, sub = jax.random.split(self.key)
        return sub


def kaiming_conv(key, out_c, in_c_per_group, k):
    # kaiming_normal_(mode='fan_out') on Conv1d weight (out_c, in_c/g, k): std=sqrt(2/(out_c*k))
    std = math.sqrt(2.0 / (out_c * k))
    return std * jax.random.normal(key, (out_c, in_c_per_group, k), dtype=jnp.float32)


def _branch_weights(kg, bid, in_c, out_c, k_max):
    """Per-branch (pointwise (in_c,out_c), tap (k_max,out_c)) weights, BN folded in,
    tap kernel centered inside the cell's common k_max window."""
    pw = kaiming_conv(kg(), out_c, in_c, 1)[:, :, 0].T * BN_SCALE        # (in_c, out_c)
    wdw = jnp.zeros((k_max, out_c), jnp.float32)
    if bid == 0:                                  # 1x1-conv-only branch -> identity tap
        wdw = wdw.at[k_max // 2, :].set(1.0)
    elif bid in (1, 2, 3, 4):                     # depthwise conv branch (second BN folded)
        k = BRANCH_K[bid]
        dw = kaiming_conv(kg(), out_c, 1, k)[:, 0, :].T * BN_SCALE       # (k, out_c)
        s = (k_max - k) // 2
        wdw = wdw.at[s:s + k, :].set(dw)
    elif bid == 5:                                # AvgPool1d(3, 2, 1), count_include_pad=True
        s = (k_max - 3) // 2
        wdw = wdw.at[s:s + 3, :].set(1.0 / 3.0)
    else:
        raise ValueError(f"unknown branch id {bid}")
    return pw, wdw


def _cell_weights(kg, ids, in_c, out_c_total):
    out_c_branch = out_c_total // len(ids)
    k_max = max(BRANCH_K[i] for i in ids)
    pws, dws = [], []
    for bid in ids:
        pw, dw = _branch_weights(kg, bid, in_c, out_c_branch, k_max)
        pws.append(pw)
        dws.append(dw)
    return jnp.concatenate(pws, axis=1), jnp.concatenate(dws, axis=1)


def make_model_params(seed=0, mode=0, classes=4, num_blocks=4, out_filters=16):
    kg = KeyGen(seed)
    normal_ids = CONFG[mode]["normal"]
    reduce_ids = CONFG[mode]["reduce"]
    params = {"classes": classes}

    stem_w = kaiming_conv(kg(), out_filters, 1, 5)                      # (C0, 1, 5)
    params["stem_w"] = stem_w[:, 0, :].T * BN_SCALE                      # (5, C0)

    C = out_filters
    blocks = []
    for _ in range(num_blocks):
        blk = {}
        blk["wpw_n"], blk["wdw_n"] = _cell_weights(kg, normal_ids, C, C)
        blk["wn_n"] = kaiming_conv(kg(), C, C, 1)[:, :, 0].T * BN_SCALE
        blk["wpw_r"], blk["wdw_r"] = _cell_weights(kg, reduce_ids, C, 2 * C)
        blk["wn_r"] = kaiming_conv(kg(), 2 * C, 2 * C, 1)[:, :, 0].T * BN_SCALE
        blocks.append(blk)
        C *= 2
    params["blocks"] = blocks

    pc = ((classes + LANES - 1) // LANES) * LANES          # lane-dense classifier slab
    fc_w = (0.01 * jax.random.normal(kg(), (classes, C), jnp.float32)).T   # (C, classes)
    params["fc_w_pad"] = jnp.zeros((C, pc), jnp.float32).at[:, :classes].set(fc_w)
    params["fc_b_pad"] = jnp.zeros((1, pc), jnp.float32)
    return params


# ----------------------------------------------------------------------------- model
def forward(params, x):
    """x: (N, 1, L) PyTorch NCL layout. Returns (logits (N,classes), features (N,C))."""
    n, cin, l = x.shape
    assert cin == 1
    x2 = jnp.transpose(x, (0, 2, 1)).reshape(n * l, 1)     # rows = (batch, position)

    # stem: Conv1d(1, 16, k=5, pad=2) + BN + ReLU, taps formed in-kernel
    s_stem, _ = make_shift_matrices(n, l, k=5, pad=2, stride=1)
    x2 = stem_call(x2, s_stem, params["stem_w"])

    cur_l = l
    for blk in params["blocks"]:
        # normal cell (stride 1): 4 branches + concat + 1x1 conv, one fused kernel
        kn = blk["wdw_n"].shape[0]
        s_n, _ = make_shift_matrices(n, cur_l, kn, kn // 2, stride=1)
        x2 = cell_call(x2, s_n, blk["wpw_n"], blk["wdw_n"], blk["wn_n"])

        # reduce cell (stride 2): 2 branches + concat + 1x1 conv, one fused kernel
        kr = blk["wdw_r"].shape[0]
        s_r, cur_l = make_shift_matrices(n, cur_l, kr, kr // 2, stride=2)
        x2 = cell_call(x2, s_r, blk["wpw_r"], blk["wdw_r"], blk["wn_r"])

    # global avg pool -> (eval-mode) dropout identity -> linear classifier
    g = make_gap_matrix(n, cur_l)
    logits_pad, feats = head_call(x2, g, params["fc_w_pad"], params["fc_b_pad"])
    return logits_pad[:, :params["classes"]], feats


if __name__ == "__main__":
    key = jax.random.PRNGKey(0)
    x = jax.random.normal(key, (2, 1, 16), dtype=jnp.float32)           # (N, C=1, L)
    params = make_model_params(seed=0, mode=0, classes=4, num_blocks=4, out_filters=16)
    out, feats = forward(params, x)
    jax.block_until_ready((out, feats))
    assert out.shape == (2, 4), out.shape
    assert feats.shape == (2, 256), feats.shape
    assert bool(jnp.all(jnp.isfinite(out))) and bool(jnp.all(jnp.isfinite(feats)))
    print("KERNEL_OK")
</pallas_src>

<mosaic_0001>
module attributes {stable_mosaic.version = 11 : i64} {
  func.func @_stem_kernel(%arg0: i32, %arg1: memref<32x1xf32, #tpu.memory_space<vmem>>, %arg2: memref<5x32x32xf32, #tpu.memory_space<vmem>>, %arg3: memref<5x16xf32, #tpu.memory_space<vmem>>, %arg4: memref<32x16xf32, #tpu.memory_space<vmem>>) attributes {dimension_semantics = [#tpu.dimension_semantics<arbitrary>], iteration_bounds = array<i64: 1>, scalar_prefetch = 0 : i64, scratch_operands = 0 : i64, tpu.core_type = #tpu.core_type<tc>, window_params = [{pipeline_mode = #tpu.pipeline_mode<synchronous>, transform_indices = @transform_0, window_bounds = array<i64: 32, 1>}, {pipeline_mode = #tpu.pipeline_mode<synchronous>, transform_indices = @transform_1, window_bounds = array<i64: 5, 32, 32>}, {pipeline_mode = #tpu.pipeline_mode<synchronous>, transform_indices = @transform_2, window_bounds = array<i64: 5, 16>}, {pipeline_mode = #tpu.pipeline_mode<synchronous>, transform_indices = @transform_3, window_bounds = array<i64: 32, 16>}]} {
    %c0 = arith.constant 0 : index
    %c0_0 = arith.constant 0 : index
    %0 = vector.load %arg1[%c0, %c0_0] : memref<32x1xf32, #tpu.memory_space<vmem>>, vector<32x1xf32>
    %1 = vector.shape_cast %0 : vector<32x1xf32> to vector<32x1xf32>
    %2 = vector.broadcast %1 : vector<32x1xf32> to vector<32x16xf32>
    %c0_1 = arith.constant 0 : index
    %c0_2 = arith.constant 0 : index
    %c0_3 = arith.constant 0 : index
    %3 = vector.load %arg2[%c0_1, %c0_2, %c0_3] : memref<5x32x32xf32, #tpu.memory_space<vmem>>, vector<1x32x32xf32>
    %4 = vector.shape_cast %3 : vector<1x32x32xf32> to vector<32x32xf32>
    %cst = arith.constant dense<0.000000e+00> : vector<32x16xf32>
    %5 = tpu.matmul %4, %2, %cst {dimension_numbers = #tpu.dot_dimension_numbers<[1], [0], [0], [1], [0, 0, 1, 1], [], []>} : vector<32x32xf32>, vector<32x16xf32>, vector<32x16xf32> -> vector<32x16xf32>
    %c0_4 = arith.constant 0 : index
    %c0_5 = arith.constant 0 : index
    %6 = vector.load %arg3[%c0_4, %c0_5] : memref<5x16xf32, #tpu.memory_space<vmem>>, vector<1x16xf32>
    %7 = vector.broadcast %6 : vector<1x16xf32> to vector<32x16xf32>
    %8 = arith.mulf %5, %7 : vector<32x16xf32>
    %c1 = arith.constant 1 : index
    %c0_6 = arith.constant 0 : index
    %c0_7 = arith.constant 0 : index
    %9 = vector.load %arg2[%c1, %c0_6, %c0_7] : memref<5x32x32xf32, #tpu.memory_space<vmem>>, vector<1x32x32xf32>
    %10 = vector.shape_cast %9 : vector<1x32x32xf32> to vector<32x32xf32>
    %cst_8 = arith.constant dense<0.000000e+00> : vector<32x16xf32>
    %11 = tpu.matmul %10, %2, %cst_8 {dimension_numbers = #tpu.dot_dimension_numbers<[1], [0], [0], [1], [0, 0, 1, 1], [], []>} : vector<32x32xf32>, vector<32x16xf32>, vector<32x16xf32> -> vector<32x16xf32>
    %c1_9 = arith.constant 1 : index
    %c0_10 = arith.constant 0 : index
    %12 = vector.load %arg3[%c1_9, %c0_10] : memref<5x16xf32, #tpu.memory_space<vmem>>, vector<1x16xf32>
    %13 = vector.broadcast %12 : vector<1x16xf32> to vector<32x16xf32>
    %14 = arith.mulf %11, %13 : vector<32x16xf32>
    %15 = arith.addf %8, %14 : vector<32x16xf32>
    %c2 = arith.constant 2 : index
    %c0_11 = arith.constant 0 : index
    %c0_12 = arith.constant 0 : index
    %16 = vector.load %arg2[%c2, %c0_11, %c0_12] : memref<5x32x32xf32, #tpu.memory_space<vmem>>, vector<1x32x32xf32>
    %17 = vector.shape_cast %16 : vector<1x32x32xf32> to vector<32x32xf32>
    %cst_13 = arith.constant dense<0.000000e+00> : vector<32x16xf32>
    %18 = tpu.matmul %17, %2, %cst_13 {dimension_numbers = #tpu.dot_dimension_numbers<[1], [0], [0], [1], [0, 0, 1, 1], [], []>} : vector<32x32xf32>, vector<32x16xf32>, vector<32x16xf32> -> vector<32x16xf32>
    %c2_14 = arith.constant 2 : index
    %c0_15 = arith.constant 0 : index
    %19 = vector.load %arg3[%c2_14, %c0_15] : memref<5x16xf32, #tpu.memory_space<vmem>>, vector<1x16xf32>
    %20 = vector.broadcast %19 : vector<1x16xf32> to vector<32x16xf32>
    %21 = arith.mulf %18, %20 : vector<32x16xf32>
    %22 = arith.addf %15, %21 : vector<32x16xf32>
    %c3 = arith.constant 3 : index
    %c0_16 = arith.constant 0 : index
    %c0_17 = arith.constant 0 : index
    %23 = vector.load %arg2[%c3, %c0_16, %c0_17] : memref<5x32x32xf32, #tpu.memory_space<vmem>>, vector<1x32x32xf32>
    %24 = vector.shape_cast %23 : vector<1x32x32xf32> to vector<32x32xf32>
    %cst_18 = arith.constant dense<0.000000e+00> : vector<32x16xf32>
    %25 = tpu.matmul %24, %2, %cst_18 {dimension_numbers = #tpu.dot_dimension_numbers<[1], [0], [0], [1], [0, 0, 1, 1], [], []>} : vector<32x32xf32>, vector<32x16xf32>, vector<32x16xf32> -> vector<32x16xf32>
    %c3_19 = arith.constant 3 : index
    %c0_20 = arith.constant 0 : index
    %26 = vector.load %arg3[%c3_19, %c0_20] : memref<5x16xf32, #tpu.memory_space<vmem>>, vector<1x16xf32>
    %27 = vector.broadcast %26 : vector<1x16xf32> to vector<32x16xf32>
    %28 = arith.mulf %25, %27 : vector<32x16xf32>
    %29 = arith.addf %22, %28 : vector<32x16xf32>
    %c4 = arith.constant 4 : index
    %c0_21 = arith.constant 0 : index
    %c0_22 = arith.constant 0 : index
    %30 = vector.load %arg2[%c4, %c0_21, %c0_22] : memref<5x32x32xf32, #tpu.memory_space<vmem>>, vector<1x32x32xf32>
    %31 = vector.shape_cast %30 : vector<1x32x32xf32> to vector<32x32xf32>
    %cst_23 = arith.constant dense<0.000000e+00> : vector<32x16xf32>
    %32 = tpu.matmul %31, %2, %cst_23 {dimension_numbers = #tpu.dot_dimension_numbers<[1], [0], [0], [1], [0, 0, 1, 1], [], []>} : vector<32x32xf32>, vector<32x16xf32>, vector<32x16xf32> -> vector<32x16xf32>
    %c4_24 = arith.constant 4 : index
    %c0_25 = arith.constant 0 : index
    %33 = vector.load %arg3[%c4_24, %c0_25] : memref<5x16xf32, #tpu.memory_space<vmem>>, vector<1x16xf32>
    %34 = vector.broadcast %33 : vector<1x16xf32> to vector<32x16xf32>
    %35 = arith.mulf %32, %34 : vector<32x16xf32>
    %36 = arith.addf %29, %35 : vector<32x16xf32>
    %cst_26 = arith.constant 0.000000e+00 : f32
    %37 = vector.broadcast %cst_26 : f32 to vector<32x16xf32>
    %38 = arith.maximumf %36, %37 : vector<32x16xf32>
    %c0_27 = arith.constant 0 : index
    %c0_28 = arith.constant 0 : index
    %39 = vector.load %arg4[%c0_27, %c0_28] : memref<32x16xf32, #tpu.memory_space<vmem>>, vector<32x16xf32>
    tpu.vector_store %arg4[%c0_27, %c0_28], %38 {strides = array<i32>} : memref<32x16xf32, #tpu.memory_space<vmem>>, vector<32x16xf32>,
    return
  }
  func.func @transform_0(%arg0: i32) -> (i32, i32) {
    %c0_i32 = arith.constant 0 : i32
    %c0_i32_0 = arith.constant 0 : i32
    %c0_i32_1 = arith.constant 0 : i32
    return %c0_i32, %c0_i32_0 : i32, i32
  }
  func.func @transform_1(%arg0: i32) -> (i32, i32, i32) {
    %c0_i32 = arith.constant 0 : i32
    %c0_i32_0 = arith.constant 0 : i32
    %c0_i32_1 = arith.constant 0 : i32
    %c0_i32_2 = arith.constant 0 : i32
    return %c0_i32, %c0_i32_0, %c0_i32_1 : i32, i32, i32
  }
  func.func @transform_2(%arg0: i32) -> (i32, i32) {
    %c0_i32 = arith.constant 0 : i32
    %c0_i32_0 = arith.constant 0 : i32
    %c0_i32_1 = arith.constant 0 : i32
    return %c0_i32, %c0_i32_0 : i32, i32
  }
  func.func @transform_3(%arg0: i32) -> (i32, i32) {
    %c0_i32 = arith.constant 0 : i32
    %c0_i32_0 = arith.constant 0 : i32
    %c0_i32_1 = arith.constant 0 : i32
    return %c0_i32, %c0_i32_0 : i32, i32
  }
}

</mosaic_0001>

<bundles_post_ra>
// kernel: tpu_custom_call.1
= control target key start
LH: loop header
LB: loop body
LE: loop exit
PB: predicated region body
PF: predicated region fallthrough
CT: control target
= control target key end

     0   :  { %8 = vsyncpa [#allocation3], 0  ;;  %s422_s15 = smov [#allocation2]   ;;  %s423_s17 = smov 128   ;;  %s512_s0 = inlined_call_operand.vmem [shape: f32[32,1], index: 0, kind: input, shape index: {}]   ;;  %s513_s1 = inlined_call_operand.hbm [shape: f32[5,32,32], index: 1, kind: input, shape index: {}]   ;;  %s514_s2 = inlined_call_operand.vmem [shape: f32[5,16], index: 2, kind: input, shape index: {}]   ;;  %s515_s3 = inlined_call_operand.vmem [shape: f32[32,16], index: 3, kind: output, shape index: {}]  }
   0x1   :  { %s15_s14 = sshll.u32 %s513_s1, 4  ;;  %s17_s16 = sshll.u32 %s422_s15, 4  ;;  %s16_s14 = int_to_ptr.hbm [resolvable:$true] %s15_s14  ;;  %s18_s16 = int_to_ptr.vmem [resolvable:$true] %s17_s16 }
   0x2   :  { %s424_s18 = smov 8  }
   0x3   :  { %23 = dma.hbm_to_vmem [thread:$0]  %s16_s14, 2560, %s18_s16, [#allocation3], %s423_s17, %s423_s17, %s424_s18  }
   0x4   :  { %420 = dma.done.wait [#allocation3], 2560  }
   0x5   :  { %421 = vsyncadd [#allocation3], 4294964736  ;;  %v425_v0 = vmov 0   ;;  %v32_v1 = vld [vmem:[%s512_s0 + $0x10] sm:$0xff]  ;;  %v33_v2 = vld [vmem:[%s512_s0 + $0x18] sm:$0xff]  ;;  %vm58_vm0 = vcmask 261120  }
   0x6   :  { %380 = vset.pattern.permute.xlu0 %v425_v0  ;;  %v381_v3 = vpack.i.bf16 %v32_v1, %v33_v2  ;;  %v30_v4 = vld [vmem:[%s512_s0] sm:$0xff]  ;;  %v31_v5 = vld [vmem:[%s512_s0 + $0x8] sm:$0xff]  ;;  %v56_v14 = vld [vmem:[#allocation2 + $0x10] sm:$0xff]  ;;  %vm334_vm1 = vcmask 130048  }
   0x7   :  { %v386_v6 = vpack.i.bf16 %v30_v4, %v31_v5  ;;  %v55_v13 = vld [vmem:[#allocation2 + $0x8] sm:$0xff]  ;;  %v57_v15 = vld [vmem:[#allocation2 + $0x18] sm:$0xff]  ;;  %v107_v16 = vld [vmem:[#allocation2 + $0x20] sm:$0xff] }
   0x8   :  { %382 = vperm.xlu0 %380, %v381_v3   ;;  %v163_v17 = vld [vmem:[#allocation2 + $0x40] sm:$0xff]  ;;  %v108_v20 = vld [vmem:[#allocation2 + $0x28] sm:$0xff]  ;;  %v109_v24 = vld [vmem:[#allocation2 + $0x30] sm:$0xff] }
   0x9   :  { %v54_v18 = vld [vmem:[#allocation2] sm:$0xff]  ;;  %v164_v21 = vld [vmem:[#allocation2 + $0x48] sm:$0xff]  ;;  %v165_v25 = vld [vmem:[#allocation2 + $0x50] sm:$0xff] }
   0xa   :  { %v219_v19 = vld [vmem:[#allocation2 + $0x60] sm:$0xff]  ;;  %v220_v23 = vld [vmem:[#allocation2 + $0x68] sm:$0xff]  ;;  %v221_v27 = vld [vmem:[#allocation2 + $0x70] sm:$0xff] }
   0xb   :  { %v275_v22 = vld [vmem:[#allocation2 + $0x80] sm:$0xff]  ;;  %v276_v26 = vld [vmem:[#allocation2 + $0x88] sm:$0xff]  ;;  %v110_v28 = vld [vmem:[#allocation2 + $0x38] sm:$0xff] }
   0xc   :  { %v166_v29 = vld [vmem:[#allocation2 + $0x58] sm:$0xff]  ;;  %v277_v30 = vld [vmem:[#allocation2 + $0x90] sm:$0xff]  ;;  %v392_v37 = vld [vmem:[%s514_s2 + $0x1] ss:$0 sm:$0xff] }
   0xd   :  { %v222_v31 = vld [vmem:[#allocation2 + $0x78] sm:$0xff]  ;;  %v391_v39 = vld [vmem:[%s514_s2] ss:$0 sm:$0xff]  ;;  %v393_v42 = vld [vmem:[%s514_s2 + $0x2] ss:$0 sm:$0xff] }
   0xe   :  { %v278_v32 = vld [vmem:[#allocation2 + $0x98] sm:$0xff]  ;;  %v394_v43 = vld [vmem:[%s514_s2 + $0x3] ss:$0 sm:$0xff]  ;;  %v395_v44 = vld [vmem:[%s514_s2 + $0x4] ss:$0 sm:$0xff] }
  0x10   :  { %387 = vperm.xlu0 %380, %v386_v6  }
  0x7a   :  { %v383_v7 = vpop.permute.xlu0 %382 }
  0x7b   :  { %v384_v8 = vunpack.i.l.bf16 %v383_v7  ;;  %v385_v9 = vunpack.i.h.bf16 %v383_v7 }
  0x7d   :  { %83 = vmatpush.msra.mxu0 %v384_v8  ;;  %364 = vmatpush.msra.mxu1 %v384_v8 }
  0x7e   :  { %365 = vmatpush.msra.mxu2 %v384_v8  ;;  %366 = vmatpush.msra.mxu3 %v384_v8 }
  0x7f   :  { %84 = vmatpush.msra.mxu0 %v385_v9  ;;  %367 = vmatpush.msra.mxu1 %v385_v9 }
  0x80   :  { %368 = vmatpush.msra.mxu2 %v385_v9  ;;  %369 = vmatpush.msra.mxu3 %v385_v9 }
  0x82   :  { %v388_v10 = vpop.permute.xlu0 %387 }
  0x83   :  { %v389_v11 = vunpack.i.l.bf16 %v388_v10  ;;  %v390_v12 = vunpack.i.h.bf16 %v388_v10 }
  0x85   :  { %85 = vmatpush.msra.mxu0 %v389_v11  ;;  %370 = vmatpush.msra.mxu1 %v389_v11 }
  0x86   :  { %371 = vmatpush.msra.mxu2 %v389_v11  ;;  %372 = vmatpush.msra.mxu3 %v389_v11 }
  0x87   :  { %86 = vmatpush.msra.mxu0 %v390_v12  ;;  %373 = vmatpush.msra.mxu1 %v390_v12 }
  0x88   :  { %374 = vmatpush.msra.mxu2 %v390_v12  ;;  %375 = vmatpush.msra.mxu3 %v390_v12 }
  0x89   :  { %345 = vmatmul.msk.f32.vlgmr.msra.gmra.mxu1 %vm58_vm0, %v55_v13  ;;  %346 = vmatmul.msk.f32.vlgmr.msra.gmra.mxu2 %vm58_vm0, %v56_v14 }
  0x8a   :  { %135 = vmatpush.msrb.mxu1 %v384_v8  ;;  %191 = vmatpush.msrb.mxu2 %v384_v8 }
  0x8b   :  { %247 = vmatpush.msrb.mxu3 %v384_v8  ;;  %303 = vmatpush.msrb.mxu0 %v384_v8 }
  0x8c   :  { %347 = vmatmul.msk.f32.vlgmr.msra.gmra.mxu3 %vm58_vm0, %v57_v15  ;;  %136 = vmatpush.msrb.mxu1 %v385_v9 }
  0x8d   :  { %192 = vmatpush.msrb.mxu2 %v385_v9  ;;  %248 = vmatpush.msrb.mxu3 %v385_v9 }
  0x8e   :  { %304 = vmatpush.msrb.mxu0 %v385_v9  ;;  %137 = vmatpush.msrb.mxu1 %v389_v11 }
  0x8f   :  { %193 = vmatpush.msrb.mxu2 %v389_v11  ;;  %249 = vmatpush.msrb.mxu3 %v389_v11 }
  0x90   :  { %305 = vmatpush.msrb.mxu0 %v389_v11  ;;  %138 = vmatpush.msrb.mxu1 %v390_v12 }
  0x91   :  { %194 = vmatpush.msrb.mxu2 %v390_v12  ;;  %250 = vmatpush.msrb.mxu3 %v390_v12 }
  0x92   :  { %306 = vmatpush.msrb.mxu0 %v390_v12  ;;  %348 = vmatmul.msk.f32.vlgmr.msrb.gmra.mxu1 %vm58_vm0, %v107_v16 }
  0x93   :  { %352 = vmatmul.msk.f32.vlgmr.msrb.gmra.mxu2 %vm58_vm0, %v163_v17  ;;  %344 = vmatmul.msk.f32.vlgmr.msra.gmra.mxu0 %vm58_vm0, %v54_v18 }
  0x94   :  { %356 = vmatmul.msk.f32.vlgmr.msrb.gmra.mxu3 %vm58_vm0, %v219_v19 }
  0x9a   :  { %349 = vmatmul.msk.f32.gmra.mxu1 %vm58_vm0, %v108_v20 }
  0x9b   :  { %353 = vmatmul.msk.f32.gmra.mxu2 %vm58_vm0, %v164_v21  ;;  %360 = vmatmul.msk.f32.vlgmr.msrb.gmra.mxu0 %vm58_vm0, %v275_v22 }
  0x9c   :  { %357 = vmatmul.msk.f32.gmra.mxu3 %vm58_vm0, %v220_v23 }
  0xa2   :  { %350 = vmatmul.msk.f32.gmra.mxu1 %vm58_vm0, %v109_v24 }
  0xa3   :  { %354 = vmatmul.msk.f32.gmra.mxu2 %vm58_vm0, %v165_v25  ;;  %361 = vmatmul.msk.f32.gmra.mxu0 %vm58_vm0, %v276_v26 }
  0xa4   :  { %358 = vmatmul.msk.f32.gmra.mxu3 %vm58_vm0, %v221_v27 }
  0xaa   :  { %351 = vmatmul.msk.f32.gmra.mxu1 %vm58_vm0, %v110_v28 }
  0xab   :  { %355 = vmatmul.msk.f32.gmra.mxu2 %vm58_vm0, %v166_v29  ;;  %362 = vmatmul.msk.f32.gmra.mxu0 %vm58_vm0, %v277_v30 }
  0xac   :  { %359 = vmatmul.msk.f32.gmra.mxu3 %vm58_vm0, %v222_v31 }
  0xb3   :  { %363 = vmatmul.msk.f32.gmra.mxu0 %vm58_vm0, %v278_v32 }
 0x106   :  { %v91_v33 = vpop.f32.mrf.mxu1 }
 0x107   :  { %v103_v56 = vmul.f32 %v391_v39, %v91_v33 }
 0x10c   :  { %v94_v34 = vpop.f32.mrf.mxu2 }
 0x10d   :  { %v104_v6 = vmul.f32 %v391_v39, %v94_v34 }
 0x10f   :  { %v97_v35 = vpop.f32.mrf.mxu3  ;;  %v140_v36 = vpop.f32.mrf.mxu1 }
 0x110   :  { %v88_v38 = vpop.f32.mrf.mxu0  ;;  %v154_v40 = vmul.f32 %v392_v37, %v140_v36  ;;  %v105_v20 = vmul.f32 %v391_v39, %v97_v35 }
 0x111   :  { %v102_v41 = vmul.f32 %v391_v39, %v88_v38 }
 0x113   :  { %v158_v46 = vadd.f32 %v154_v40, %v102_v41 }
 0x116   :  { %v196_v45 = vpop.f32.mrf.mxu2 }
 0x117   :  { %v210_v47 = vmul.f32 %v393_v42, %v196_v45  ;;  %v143_v48 = vpop.f32.mrf.mxu1  ;;  %v252_v49 = vpop.f32.mrf.mxu3 }
 0x118   :  { %v266_v50 = vmul.f32 %v394_v43, %v252_v49  ;;  %v308_v51 = vpop.f32.mrf.mxu0  ;;  %v155_v54 = vmul.f32 %v392_v37, %v143_v48 }
 0x119   :  { %v214_v52 = vadd.f32 %v210_v47, %v158_v46  ;;  %v322_v53 = vmul.f32 %v395_v44, %v308_v51 }
 0x11a   :  { %v159_v59 = vadd.f32 %v155_v54, %v103_v56 }
 0x11b   :  { %v270_v55 = vadd.f32 %v266_v50, %v214_v52 }
 0x11d   :  { %v326_v57 = vadd.f32 %v322_v53, %v270_v55 }
 0x11e   :  { %v199_v58 = vpop.f32.mrf.mxu2 }
 0x11f   :  { %v330_v60 = vmax.f32 %v326_v57, 0.0  ;;  %v211_v61 = vmul.f32 %v393_v42, %v199_v58  ;;  %v146_v62 = vpop.f32.mrf.mxu1  ;;  %v255_v63 = vpop.f32.mrf.mxu3 }
 0x120   :  { %v267_v0 = vmul.f32 %v394_v43, %v255_v63  ;;  %v311_v1 = vpop.f32.mrf.mxu0  ;;  %v156_v4 = vmul.f32 %v392_v37, %v146_v62 }
 0x121   :  { %335 = vst.msk [vmem:[%s515_s3] sm:$0xff] %vm334_vm1, %v330_v60  ;;  %v215_v2 = vadd.f32 %v211_v61, %v159_v59  ;;  %v323_v3 = vmul.f32 %v395_v44, %v311_v1 }
 0x122   :  { %v160_v9 = vadd.f32 %v156_v4, %v104_v6 }
 0x123   :  { %v271_v5 = vadd.f32 %v267_v0, %v215_v2 }
 0x125   :  { %v327_v7 = vadd.f32 %v323_v3, %v271_v5 }
 0x126   :  { %v202_v8 = vpop.f32.mrf.mxu2 }
 0x127   :  { %v331_v10 = vmax.f32 %v327_v7, 0.0  ;;  %v212_v11 = vmul.f32 %v393_v42, %v202_v8  ;;  %v258_v12 = vpop.f32.mrf.mxu3  ;;  %v149_v13 = vpop.f32.mrf.mxu1 }
 0x128   :  { %v268_v14 = vmul.f32 %v394_v43, %v258_v12  ;;  %v314_v15 = vpop.f32.mrf.mxu0  ;;  %v157_v18 = vmul.f32 %v392_v37, %v149_v13 }
 0x129   :  { %336 = vst.msk [vmem:[%s515_s3 + $0x8] sm:$0xff] %vm334_vm1, %v331_v10  ;;  %v216_v16 = vadd.f32 %v212_v11, %v160_v9  ;;  %v324_v17 = vmul.f32 %v395_v44, %v314_v15 }
 0x12a   :  { %v161_v23 = vadd.f32 %v157_v18, %v105_v20 }
 0x12b   :  { %v272_v19 = vadd.f32 %v268_v14, %v216_v16 }
 0x12d   :  { %v328_v21 = vadd.f32 %v324_v17, %v272_v19 }
 0x12e   :  { %v205_v22 = vpop.f32.mrf.mxu2 }
 0x12f   :  { %v332_v24 = vmax.f32 %v328_v21, 0.0  ;;  %v213_v25 = vmul.f32 %v393_v42, %v205_v22  ;;  %v261_v26 = vpop.f32.mrf.mxu3 }
 0x130   :  { %v269_v27 = vmul.f32 %v394_v43, %v261_v26  ;;  %v317_v28 = vpop.f32.mrf.mxu0 }
 0x131   :  { %337 = vst.msk [vmem:[%s515_s3 + $0x10] sm:$0xff] %vm334_vm1, %v332_v24  ;;  %v217_v29 = vadd.f32 %v213_v25, %v161_v23  ;;  %v325_v30 = vmul.f32 %v395_v44, %v317_v28 }
 0x133   :  { %v273_v31 = vadd.f32 %v269_v27, %v217_v29 }
 0x135   :  { %v329_v32 = vadd.f32 %v325_v30, %v273_v31 }
 0x137   :  { %v333_v33 = vmax.f32 %v329_v32, 0.0 }
 0x139   :  { %338 = vst.msk [vmem:[%s515_s3 + $0x18] sm:$0xff] %vm334_vm1, %v333_v33 }
 0x13a   :  { %343 = vsyncpa [#allocation3], 1 }

</bundles_post_ra>
